<compile_context>
chip_gen: v7x
topology: tpu7x:2x2x1
jax: 0.10.0
libtpu: 0.0.40
codegen_flags: <defaults>
</compile_context>

<pallas_src>
import math

import jax
import jax.numpy as jnp
from jax.experimental import pallas as pl
from jax.experimental.pallas import tpu as pltpu


def _round_up(x: int, m: int) -> int:
    return (x + m - 1) // m * m


def bilinear_kernel(x1_ref, x2_ref, w_ref, b_ref, o_ref, acc_ref):
    """Grid = (m, o, k).  Per step:
         x1_ref : (tm, tk1)      column block of input1
         x2_ref : (tm, I2)       full input2 features for this batch tile
         w_ref  : (tk1*I2, to)   bf16 weight K-tile
         b_ref  : (1, to)        f32 bias tile
         o_ref  : (tm, to)       output tile (written on last k)
         acc_ref: (tm, to) f32 scratch, resident across the k axis.
    """
    k = pl.program_id(2)

    @pl.when(k == 0)
    def _():
        acc_ref[...] = jnp.zeros_like(acc_ref)

    x1 = x1_ref[...].astype(jnp.float32)             # (tm, tk1)
    x2 = x2_ref[...].astype(jnp.float32)             # (tm, I2)
    tm, tk1 = x1.shape
    i2 = x2.shape[1]

    # Only this K-tile's slice of the per-sample outer product is built:
    # (tm, tk1, I2) -> (tm, tk1*I2).  Outer product in f32 on the VPU (v5e has
    # no bf16 VPU); cast to the streamed weight dtype only to feed the MXU.
    outer = (x1[:, :, None] * x2[:, None, :]).reshape(tm, tk1 * i2)
    acc_ref[...] += jnp.dot(outer.astype(w_ref.dtype), w_ref[...],
                            preferred_element_type=jnp.float32)

    @pl.when(k == pl.num_programs(2) - 1)
    def _():
        o_ref[...] = (acc_ref[...] + b_ref[...]).astype(o_ref.dtype)


def prepare_bilinear_params(weight, bias, *, weight_dtype=jnp.bfloat16):
    """One-time parameter prep (call once at init, NOT per forward).

    weight (O, I1, I2) -> w_flat (I1*I2, O_pad) in `weight_dtype`
    bias   (O,)        -> (1, O_pad) f32, zero-padded to a multiple of 128.
    """
    out_features, i1, i2 = weight.shape
    o_pad = _round_up(out_features, 128)
    w_flat = jnp.transpose(weight, (1, 2, 0)).reshape(i1 * i2, out_features)
    w_flat = jnp.pad(w_flat, ((0, 0), (0, o_pad - out_features)))
    w_flat = w_flat.astype(weight_dtype)
    if bias is None:
        b2d = jnp.zeros((1, o_pad), jnp.float32)
    else:
        b2d = jnp.pad(bias.astype(jnp.float32),
                      (0, o_pad - out_features)).reshape(1, o_pad)
    return w_flat, b2d


def bilinear(x1, x2, w_flat, b2d, out_features):
    """x1: (..., I1), x2: (..., I2), w_flat: (I1*I2, O_pad), b2d: (1, O_pad)."""
    i1 = x1.shape[-1]
    i2 = x2.shape[-1]
    lead = x1.shape[:-1]
    n = 1
    for d in lead:
        n *= d
    x1m = x1.reshape(n, i1)
    x2m = x2.reshape(n, i2)

    k_total, o_pad = w_flat.shape
    assert k_total == i1 * i2, "w_flat must be (I1*I2, O_pad)"

    # ---- tile selection -----------------------------------------------------
    tm = min(256, _round_up(n, 8))            # batch tile (multiple of 8)
    n_pad = _round_up(n, tm)

    if o_pad <= 512:                          # output tile: multiple of 128
        to = o_pad
    elif o_pad % 512 == 0:
        to = 512
    elif o_pad % 256 == 0:
        to = 256
    else:
        to = 128

    # K is tiled along I1 only: a contiguous K block == a block of x1 columns
    # (the x1 block's last dim must be 128-aligned unless it covers all of I1).
    if i1 > 128 and i1 % 128 == 0:
        tk1 = 128
    else:
        tk1 = i1
    # TODO(synk): for very large I2*to, also tile I2 (needs a blocked weight
    # re-layout at prep time); not needed at these sizes.

    grid = (n_pad // tm, o_pad // to, i1 // tk1)

    x1p = jnp.pad(x1m, ((0, n_pad - n), (0, 0)))
    x2p = jnp.pad(x2m, ((0, n_pad - n), (0, 0)))

    out_dtype = x1.dtype
    flops = 2 * n_pad * k_total * o_pad
    bytes_accessed = (k_total * o_pad * w_flat.dtype.itemsize
                      + n_pad * (i1 + i2) * x1p.dtype.itemsize
                      + n_pad * o_pad * jnp.dtype(out_dtype).itemsize)

    out = pl.pallas_call(
        bilinear_kernel,
        out_shape=jax.ShapeDtypeStruct((n_pad, o_pad), out_dtype),
        grid_spec=pltpu.PrefetchScalarGridSpec(
            num_scalar_prefetch=0,
            grid=grid,
            in_specs=[
                pl.BlockSpec((tm, tk1), lambda m, o, k: (m, k)),       # x1
                pl.BlockSpec((tm, i2), lambda m, o, k: (m, 0)),        # x2
                pl.BlockSpec((tk1 * i2, to), lambda m, o, k: (k, o)),  # w_flat
                pl.BlockSpec((1, to), lambda m, o, k: (0, o)),         # bias
            ],
            out_specs=pl.BlockSpec((tm, to), lambda m, o, k: (m, o)),
            scratch_shapes=[pltpu.VMEM((tm, to), jnp.float32)],        # acc
        ),
        compiler_params=pltpu.CompilerParams(
            # k (reduction) is last and "arbitrary"; m/o shard across TCs on v7x.
            dimension_semantics=("parallel", "parallel", "arbitrary"),
            # Safe on all generations (v5e default is only 16 MiB); the working
            # set here is far below it.  Raise toward ~100 MiB on v5e/v6e if
            # using much larger weight tiles.
            vmem_limit_bytes=32 * 1024 * 1024,
        ),
        cost_estimate=pl.CostEstimate(
            flops=flops, transcendentals=0, bytes_accessed=bytes_accessed),
    )(x1p, x2p, w_flat, b2d)

    return out[:n, :out_features].reshape(*lead, out_features)


if __name__ == "__main__":
    # Module config (small, layout-friendly sizes).
    N = 8            # batch
    IN1 = 16         # in1_features
    IN2 = 128        # in2_features
    OUT = 32         # out_features

    key = jax.random.PRNGKey(0)
    k_w, k_b, k_x1, k_x2 = jax.random.split(key, 4)

    # Deterministic init mirroring nn.Bilinear.reset_parameters:
    # U(-1/sqrt(in1_features), +1/sqrt(in1_features)).
    bound = 1.0 / math.sqrt(IN1)
    weight = jax.random.uniform(
        k_w, (OUT, IN1, IN2), minval=-bound, maxval=bound, dtype=jnp.float32)
    bias = jax.random.uniform(
        k_b, (OUT,), minval=-bound, maxval=bound, dtype=jnp.float32)

    x1 = jax.random.normal(k_x1, (N, IN1), dtype=jnp.float32)
    x2 = jax.random.normal(k_x2, (N, IN2), dtype=jnp.float32)

    # One-time parameter prep (bf16 weight streaming, lane-dense O padding).
    w_flat, b2d = prepare_bilinear_params(weight, bias)

    y = bilinear(x1, x2, w_flat, b2d, OUT)
    y = jax.block_until_ready(y)
    assert y.shape == (N, OUT)

    # Reference mirroring the kernel's numerics (bf16-rounded operands fed to
    # the MXU, f32 accumulation) -> tight tolerance.
    w_bf = weight.astype(jnp.bfloat16).astype(jnp.float32)
    outer_bf = (x1[:, :, None] * x2[:, None, :]).astype(
        jnp.bfloat16).astype(jnp.float32)
    y_matched = jnp.einsum("nij,oij->no", outer_bf, w_bf) + bias
    assert jnp.allclose(y, y_matched, atol=5e-3, rtol=5e-3), (
        float(jnp.max(jnp.abs(y - y_matched))))

    # Pure-f32 F.bilinear semantics check (loose tolerance for the bf16
    # weight-streaming path).
    y_f32 = jnp.einsum("ni,oij,nj->no", x1, weight, x2) + bias
    assert jnp.allclose(y, y_f32, atol=0.5, rtol=0.05), (
        float(jnp.max(jnp.abs(y - y_f32))))

    print("KERNEL_OK")
</pallas_src>

<mosaic_0001>
module attributes {stable_mosaic.version = 11 : i64} {
  func.func @bilinear_kernel(%arg0: i32, %arg1: i32, %arg2: i32, %arg3: memref<8x16xf32, #tpu.memory_space<vmem>>, %arg4: memref<8x128xf32, #tpu.memory_space<vmem>>, %arg5: memref<2048x128xbf16, #tpu.memory_space<vmem>>, %arg6: memref<1x128xf32, #tpu.memory_space<vmem>>, %arg7: memref<8x128xf32, #tpu.memory_space<vmem>>, %arg8: memref<8x128xf32, #tpu.memory_space<vmem>>) attributes {dimension_semantics = [#tpu.dimension_semantics<parallel>, #tpu.dimension_semantics<parallel>, #tpu.dimension_semantics<arbitrary>], iteration_bounds = array<i64: 1, 1, 1>, scalar_prefetch = 0 : i64, scratch_operands = 1 : i64, tpu.core_type = #tpu.core_type<tc>, window_params = [{transform_indices = @transform_0, window_bounds = array<i64: 8, 16>}, {transform_indices = @transform_1, window_bounds = array<i64: 8, 128>}, {transform_indices = @transform_2, window_bounds = array<i64: 2048, 128>}, {transform_indices = @transform_3, window_bounds = array<i64: 1, 128>}, {transform_indices = @transform_4, window_bounds = array<i64: 8, 128>}]} {
    %c0_i32 = arith.constant 0 : i32
    %0 = arith.cmpi eq, %arg2, %c0_i32 : i32
    %1 = arith.extui %0 : i1 to i32
    %c0_i32_0 = arith.constant 0 : i32
    %2 = arith.cmpi ne, %1, %c0_i32_0 : i32
    scf.if %2 {
      %cst_12 = arith.constant 0.000000e+00 : f32
      %20 = vector.broadcast %cst_12 : f32 to vector<8x128xf32>
      %c0_13 = arith.constant 0 : index
      %c0_14 = arith.constant 0 : index
      %21 = vector.load %arg8[%c0_13, %c0_14] : memref<8x128xf32, #tpu.memory_space<vmem>>, vector<8x128xf32>
      tpu.vector_store %arg8[%c0_13, %c0_14], %20 {strides = array<i32>} : memref<8x128xf32, #tpu.memory_space<vmem>>, vector<8x128xf32>,
    } else {
    }
    %c0 = arith.constant 0 : index
    %c0_1 = arith.constant 0 : index
    %3 = vector.load %arg3[%c0, %c0_1] : memref<8x16xf32, #tpu.memory_space<vmem>>, vector<8x16xf32>
    %c0_2 = arith.constant 0 : index
    %c0_3 = arith.constant 0 : index
    %4 = vector.load %arg4[%c0_2, %c0_3] : memref<8x128xf32, #tpu.memory_space<vmem>>, vector<8x128xf32>
    %5 = vector.shape_cast %3 : vector<8x16xf32> to vector<8x16x1xf32>
    %6 = vector.shape_cast %4 : vector<8x128xf32> to vector<8x1x128xf32>
    %7 = vector.broadcast %5 : vector<8x16x1xf32> to vector<8x16x128xf32>
    %8 = vector.broadcast %6 : vector<8x1x128xf32> to vector<8x16x128xf32>
    %9 = arith.mulf %7, %8 : vector<8x16x128xf32>
    %10 = vector.shape_cast %9 : vector<8x16x128xf32> to vector<8x2048xf32>
    %c0_4 = arith.constant 0 : index
    %c0_5 = arith.constant 0 : index
    %11 = vector.load %arg8[%c0_4, %c0_5] : memref<8x128xf32, #tpu.memory_space<vmem>>, vector<8x128xf32>
    %12 = arith.truncf %10 : vector<8x2048xf32> to vector<8x2048xbf16>
    %c0_6 = arith.constant 0 : index
    %c0_7 = arith.constant 0 : index
    %13 = vector.load %arg5[%c0_6, %c0_7] : memref<2048x128xbf16, #tpu.memory_space<vmem>>, vector<2048x128xbf16>
    %cst = arith.constant dense<0.000000e+00> : vector<8x128xf32>
    %14 = tpu.matmul %12, %13, %cst {dimension_numbers = #tpu.dot_dimension_numbers<[1], [0], [0], [1], [0, 0, 1, 1], [], []>} : vector<8x2048xbf16>, vector<2048x128xbf16>, vector<8x128xf32> -> vector<8x128xf32>
    %15 = arith.addf %11, %14 : vector<8x128xf32>
    %c0_8 = arith.constant 0 : index
    %c0_9 = arith.constant 0 : index
    %16 = vector.load %arg8[%c0_8, %c0_9] : memref<8x128xf32, #tpu.memory_space<vmem>>, vector<8x128xf32>
    tpu.vector_store %arg8[%c0_8, %c0_9], %15 {strides = array<i32>} : memref<8x128xf32, #tpu.memory_space<vmem>>, vector<8x128xf32>,
    %c0_i32_10 = arith.constant 0 : i32
    %17 = arith.cmpi eq, %arg2, %c0_i32_10 : i32
    %18 = arith.extui %17 : i1 to i32
    %c0_i32_11 = arith.constant 0 : i32
    %19 = arith.cmpi ne, %18, %c0_i32_11 : i32
    scf.if %19 {
      %c0_12 = arith.constant 0 : index
      %c0_13 = arith.constant 0 : index
      %20 = vector.load %arg8[%c0_12, %c0_13] : memref<8x128xf32, #tpu.memory_space<vmem>>, vector<8x128xf32>
      %c0_14 = arith.constant 0 : index
      %c0_15 = arith.constant 0 : index
      %21 = vector.load %arg6[%c0_14, %c0_15] : memref<1x128xf32, #tpu.memory_space<vmem>>, vector<1x128xf32>
      %22 = vector.broadcast %21 : vector<1x128xf32> to vector<8x128xf32>
      %23 = arith.addf %20, %22 : vector<8x128xf32>
      %c0_16 = arith.constant 0 : index
      %c0_17 = arith.constant 0 : index
      %24 = vector.load %arg7[%c0_16, %c0_17] : memref<8x128xf32, #tpu.memory_space<vmem>>, vector<8x128xf32>
      tpu.vector_store %arg7[%c0_16, %c0_17], %23 {strides = array<i32>} : memref<8x128xf32, #tpu.memory_space<vmem>>, vector<8x128xf32>,
    } else {
    }
    return
  }
  func.func @transform_0(%arg0: i32, %arg1: i32, %arg2: i32) -> (i32, i32) {
    %c0_i32 = arith.constant 0 : i32
    return %arg0, %arg2 : i32, i32
  }
  func.func @transform_1(%arg0: i32, %arg1: i32, %arg2: i32) -> (i32, i32) {
    %c0_i32 = arith.constant 0 : i32
    %c0_i32_0 = arith.constant 0 : i32
    return %arg0, %c0_i32 : i32, i32
  }
  func.func @transform_2(%arg0: i32, %arg1: i32, %arg2: i32) -> (i32, i32) {
    %c0_i32 = arith.constant 0 : i32
    return %arg2, %arg1 : i32, i32
  }
  func.func @transform_3(%arg0: i32, %arg1: i32, %arg2: i32) -> (i32, i32) {
    %c0_i32 = arith.constant 0 : i32
    %c0_i32_0 = arith.constant 0 : i32
    return %c0_i32, %arg1 : i32, i32
  }
  func.func @transform_4(%arg0: i32, %arg1: i32, %arg2: i32) -> (i32, i32) {
    %c0_i32 = arith.constant 0 : i32
    return %arg0, %arg1 : i32, i32
  }
}

</mosaic_0001>

<bundles_post_ra>
// kernel: tpu_custom_call.1
= control target key start
LH: loop header
LB: loop body
LE: loop exit
PB: predicated region body
PF: predicated region fallthrough
CT: control target
= control target key end

     0   :  { %9 = vsyncpa [#allocation4], 0  ;;  %s2699_s0 = inlined_call_operand.hbm [shape: f32[8,16], index: 0, kind: input, shape index: {}]   ;;  %s2700_s1 = inlined_call_operand.hbm [shape: f32[8,128], index: 1, kind: input, shape index: {}]   ;;  %s2701_s2 = inlined_call_operand.hbm [shape: bf16[2048,128], index: 2, kind: input, shape index: {}]   ;;  %s2702_s3 = inlined_call_operand.vmem [shape: f32[1,128], index: 3, kind: input, shape index: {}]   ;;  %s2703_s4 = inlined_call_operand.hbm [shape: f32[8,128], index: 4, kind: output, shape index: {}]  }
   0x1   :  { %10 = vsyncpa [#allocation7], 0 }
   0x2   :  { %11 = vsyncpa [#allocation5], 0  ;;  %s2458_s15 = smov [#allocation6]   ;;  %s2459_s17 = smov [#allocation3]  }
   0x3   :  { %s28_s16 = sshll.u32 %s2458_s15, 4  ;;  %s18_s18 = sshll.u32 %s2459_s17, 4  ;;  %s29_s16 = int_to_ptr.vmem [resolvable:$true] %s28_s16  ;;  %s19_s18 = int_to_ptr.vmem [resolvable:$true] %s18_s18 }
   0x4   :  { %s2364_s21 = scalar_lea.hbm %s2700_s1, 128 }
   0x5   :  { %p2365_p0 = scmp.ne.s32.totalorder %s2700_s1, %s2364_s21  ;;  %p2368_p1 = scmp.lt.u32.totalorder %s2364_s21, %s2700_s1 }
   0x7   :  { %p2370_p2 = pnand %p2368_p1, %p2365_p0 }
   0x9   :  { %2373 = shalt.err (!%p2370_p2)
}
   0xa   :  { %s2374_s26 = scalar_lea.vmem %s29_s16, 128  ;;  %p2379_p4 = scmp.lt.s32.totalorder %s29_s16, %s29_s16 }
   0xb   :  { %p2375_p3 = scmp.ne.s32.totalorder %s29_s16, %s2374_s26  ;;  %p2380_p5 = scmp.lt.s32.totalorder %s2374_s26, %s2374_s26 }
   0xd   :  { %p2381_p6 = por %p2380_p5, %p2379_p4 }
   0xf   :  { %p2382_p7 = pnand %p2381_p6, %p2375_p3 }
  0x11   :  { %2385 = shalt.err (!%p2382_p7)
}
  0x12   :  { %31 = dma.hbm_to_vmem [thread:$0]  %s2700_s1, 128, %s29_s16, [#allocation7]  }
  0x13   :  { %s2386_s5 = scalar_lea.hbm %s2699_s0, 128 }
  0x14   :  { %p2387_p8 = scmp.ne.s32.totalorder %s2699_s0, %s2386_s5  ;;  %p2390_p9 = scmp.lt.u32.totalorder %s2386_s5, %s2699_s0 }
  0x16   :  { %p2392_p10 = pnand %p2390_p9, %p2387_p8 }
  0x18   :  { %2395 = shalt.err (!%p2392_p10)
}
  0x19   :  { %s2396_s10 = scalar_lea.vmem %s19_s18, 128  ;;  %p2401_p12 = scmp.lt.s32.totalorder %s19_s18, %s19_s18 }
  0x1a   :  { %p2397_p11 = scmp.ne.s32.totalorder %s19_s18, %s2396_s10  ;;  %p2402_p13 = scmp.lt.s32.totalorder %s2396_s10, %s2396_s10 }
  0x1c   :  { %p2403_p0 = por %p2402_p13, %p2401_p12 }
  0x1e   :  { %p2404_p1 = pnand %p2403_p0, %p2397_p11 }
  0x20   :  { %2407 = shalt.err (!%p2404_p1)
}
  0x21   :  { %21 = dma.hbm_to_vmem [thread:$0]  %s2699_s0, 128, %s19_s18, [#allocation4]  }
  0x22   :  { %s2460_s12 = smov [#allocation8]   ;;  %s2408_s16 = scalar_lea.hbm %s2701_s2, 16384 }
  0x23   :  { %s37_s13 = sshll.u32 %s2460_s12, 4  ;;  %p2409_p2 = scmp.ne.s32.totalorder %s2701_s2, %s2408_s16  ;;  %s38_s13 = int_to_ptr.vmem [resolvable:$true] %s37_s13 }
  0x24   :  { %p2412_p3 = scmp.lt.u32.totalorder %s2408_s16, %s2701_s2 }
  0x26   :  { %p2414_p4 = pnand %p2412_p3, %p2409_p2 }
  0x28   :  { %2417 = shalt.err (!%p2414_p4)
}
  0x29   :  { %s2418_s22 = scalar_lea.vmem %s38_s13, 16384  ;;  %p2423_p6 = scmp.lt.s32.totalorder %s38_s13, %s38_s13 }
  0x2a   :  { %p2419_p5 = scmp.ne.s32.totalorder %s38_s13, %s2418_s22  ;;  %p2424_p7 = scmp.lt.s32.totalorder %s2418_s22, %s2418_s22 }
  0x2c   :  { %p2425_p8 = por %p2424_p7, %p2423_p6 }
  0x2e   :  { %p2426_p9 = pnand %p2425_p8, %p2419_p5 }
  0x30   :  { %2429 = shalt.err (!%p2426_p9)
}
  0x31   :  { %s2461_s0 = smov 64   ;;  %s2462_s18 = smov 4  }
  0x32   :  { %43 = dma.hbm_to_vmem [thread:$0]  %s2701_s2, 16384, %s38_s13, [#allocation7], %s2461_s0, %s2461_s0, %s2462_s18  }
  0x33   :  { %2452 = dma.done.wait [#allocation4], 128  }
  0x34   :  { %2453 = vsyncadd [#allocation4], 4294967168 }
  0x35   :  { %2454 = dma.done.wait [#allocation7], 16512  }
  0x36   :  { %2455 = vsyncadd [#allocation7], 4294950784  ;;  %v63_v0 = vlaneseq  ;;  %v2463_v4 = vmov 1966171168   ;;  %v61_v8 = vld [vmem:[#allocation3] sm:$0xff]  ;;  %v2235_v12 = vld [vmem:[#allocation8 + $0x40] sm:$0xff]  }
  0x37   :  { %v154_v5 = vunpack.c.l.s4 %v2463_v4  ;;  %v2236_v15 = vld [vmem:[#allocation8 + $0xc0] sm:$0xff]   ;;  %2050 = vmatprep.subr.bf16.mxu0 %v2235_v12  ;;  %v2239_v21 = vld [vmem:[#allocation8 + $0x48] sm:$0xff]   ;;  %v62_v29 = vld [vmem:[#allocation6] sm:$0xff]  ;;  %s2466_s26 = smov [#allocation9]  }
  0x38   :  { %v2528_v1 = vshrl.u32 %v63_v0, 7  ;;  %v2237_v18 = vld [vmem:[#allocation8] sm:$0xff]   ;;  %2072 = vmatprep.subr.bf16.mxu1 %v2236_v15  ;;  %v2240_v24 = vld [vmem:[#allocation8 + $0xc8] sm:$0xff]   ;;  %v2243_v31 = vld [vmem:[#allocation8 + $0x50] sm:$0xff]   ;;  %v152_v32 = vcombine.high %v62_v29, %v62_v29  ;;  %s1911_s27 = sshll.u32 %s2466_s26, 4  ;;  %s1912_s27 = int_to_ptr.vmem [resolvable:$true] %s1911_s27 }
  0x39   :  { %v155_v13 = vunpack.c.0.s8 %v154_v5  ;;  %v2238_v19 = vld [vmem:[#allocation8 + $0x80] sm:$0xff]   ;;  %2051 = vmatpush3.bf16.msra.mxu0 %v2237_v18  ;;  %v2241_v27 = vld [vmem:[#allocation8 + $0x8] sm:$0xff]   ;;  %v2244_v35 = vld [vmem:[#allocation8 + $0xd0] sm:$0xff]   ;;  %s2430_s28 = scalar_lea.vmem %s1912_s27, 128  ;;  %p2435_p11 = scmp.lt.s32.totalorder %s1912_s27, %s1912_s27 }
  0x3a   :  { %v87_v2 = vsub.s32 2, %v2528_v1  ;;  %v2532_v3 = vsub.s32 0, %v2528_v1  ;;  %v98_v6 = vsub.s32 3, %v2528_v1  ;;  %v76_v7 = vsub.s32 1, %v2528_v1  ;;  %2073 = vmatpush3.bf16.msra.mxu1 %v2238_v19  ;;  %v2242_v28 = vld [vmem:[#allocation8 + $0x88] sm:$0xff]   ;;  %2052 = vmatprep.subr.bf16.mxu0 %v2239_v21  ;;  %v2245_v37 = vld [vmem:[#allocation8 + $0x10] sm:$0xff]   ;;  %p2431_p10 = scmp.ne.s32.totalorder %s1912_s27, %s2430_s28  ;;  %p2436_p12 = scmp.lt.s32.totalorder %s2430_s28, %s2430_s28 }
  0x3b   :  { %v120_v11 = vsub.s32 5, %v2528_v1  ;;  %v109_v14 = vsub.s32 4, %v2528_v1  ;;  %v142_v20 = vsub.s32 7, %v2528_v1  ;;  %v158_v22 = vsub.s32 %v155_v13, %v2528_v1  ;;  %2074 = vmatprep.subr.bf16.mxu1 %v2240_v24  ;;  %v2246_v38 = vld [vmem:[#allocation8 + $0x90] sm:$0xff]   ;;  %v2247_v44 = vld [vmem:[#allocation8 + $0x58] sm:$0xff]   ;;  %v2252_v57 = vld [vmem:[#allocation8 + $0x60] sm:$0xff]  }
  0x3c   :  { %v2536_v9 = vrot.slane %v61_v8, %v87_v2  ;;  %v2539_v10 = vrot.slane %v61_v8, %v2532_v3  ;;  %v2545_v16 = vrot.slane %v61_v8, %v98_v6  ;;  %v2547_v17 = vrot.slane %v61_v8, %v76_v7  ;;  %v2248_v45 = vld [vmem:[#allocation8 + $0xd8] sm:$0xff]   ;;  %v2253_v59 = vld [vmem:[#allocation8 + $0xe0] sm:$0xff]   ;;  %v2256_v2 = vld [vmem:[#allocation8 + $0x68] sm:$0xff]   ;;  %p2437_p13 = por %p2436_p12, %p2435_p11 }
  0x3d   :  { %v131_v23 = vsub.s32 6, %v2528_v1  ;;  %v2554_v25 = vrot.slane %v61_v8, %v120_v11  ;;  %v2556_v26 = vrot.slane %v61_v8, %v109_v14  ;;  %2053 = vmatpush3.bf16.msra.mxu0 %v2241_v27  ;;  %v159_v30 = vrot.slane %v62_v29, %v158_v22  ;;  %v2249_v51 = vld [vmem:[#allocation8 + $0x18] sm:$0xff]   ;;  %v2254_v62 = vld [vmem:[#allocation8 + $0x20] sm:$0xff]   ;;  %v2257_v4 = vld [vmem:[#allocation8 + $0xe8] sm:$0xff]  }
  0x3e   :  { %90 = vbcast.lane.b32.xlu1 %v2536_v9, 256  ;;  %68 = vbcast.lane.b32.xlu0 %v2539_v10, 256  ;;  %v2558_v33 = vrot.slane %v61_v8, %v142_v20  ;;  %v166_v40 = vrot.slane %v152_v32, %v158_v22  ;;  %v2250_v52 = vld [vmem:[#allocation8 + $0x98] sm:$0xff]   ;;  %v2255_v63 = vld [vmem:[#allocation8 + $0xa0] sm:$0xff]   ;;  %v2258_v5 = vld [vmem:[#allocation8 + $0x28] sm:$0xff]   ;;  %p2438_p0 = pnand %p2437_p13, %p2431_p10 }
  0x3f   :  { %2075 = vmatpush3.bf16.msra.mxu1 %v2242_v28  ;;  %v2560_v34 = vrot.slane %v61_v8, %v131_v23  ;;  %v175_v36 = vrot.slane %v159_v30, %v158_v22  ;;  %v167_v39 = vcombine.high %v159_v30, %v159_v30  ;;  %2054 = vmatprep.subr.bf16.mxu0 %v2243_v31  ;;  %v2259_v6 = vld [vmem:[#allocation8 + $0xa8] sm:$0xff]   ;;  %v2260_v7 = vld [vmem:[#allocation8 + $0x70] sm:$0xff]   ;;  %v2264_v11 = vld [vmem:[#allocation8 + $0x78] sm:$0xff]   ;;  %v2465_v19 = vmov 1934713408  }
  0x40   :  { %2076 = vmatprep.subr.bf16.mxu1 %v2244_v35  ;;  %v168_v46 = vcombine.high %v166_v40, %v166_v40  ;;  %v182_v47 = vrot.slane %v166_v40, %v158_v22  ;;  %v2261_v8 = vld [vmem:[#allocation8 + $0xf0] sm:$0xff]   ;;  %v2266_v12 = vld [vmem:[#allocation8 + $0x38] sm:$0xff]   ;;  %v2268_v14 = vld [vmem:[#allocation8 + $0x140] sm:$0xff]   ;;  %v324_v20 = vunpack.c.l.s4 %v2465_v19 }
  0x41   :  { %v197_v41 = vcombine.high %v175_v36, %v175_v36  ;;  %v2565_v42 = vrot.slane %v175_v36, %v2532_v3  ;;  %2055 = vmatpush3.bf16.msra.mxu0 %v2245_v37  ;;  %v189_v43 = vrot.slane %v167_v39, %v158_v22  ;;  %v2267_v13 = vld [vmem:[#allocation8 + $0xb8] sm:$0xff]   ;;  %v2269_v15 = vld [vmem:[#allocation8 + $0x1c0] sm:$0xff]  }
  0x42   :  { %101 = vbcast.lane.b32.xlu1 %v2545_v16, 256  ;;  %79 = vbcast.lane.b32.xlu0 %v2547_v17, 256  ;;  %v196_v53 = vrot.slane %v168_v46, %v158_v22  ;;  %v2576_v54 = vrot.slane %v182_v47, %v2532_v3  ;;  %v198_v55 = vcombine.high %v182_v47, %v182_v47  ;;  %v325_v28 = vunpack.c.0.s8 %v324_v20 }
  0x43   :  { %2077 = vmatpush3.bf16.msra.mxu1 %v2246_v38  ;;  %v2570_v48 = vrot.slane %v197_v41, %v2532_v3  ;;  %v199_v49 = vcombine.high %v189_v43, %v189_v43  ;;  %v2573_v50 = vrot.slane %v189_v43, %v2532_v3  ;;  %2056 = vmatprep.subr.bf16.mxu0 %v2247_v44 }
  0x44   :  { %2078 = vmatprep.subr.bf16.mxu1 %v2248_v45  ;;  %v2582_v58 = vrot.slane %v196_v53, %v2532_v3  ;;  %v200_v60 = vcombine.high %v196_v53, %v196_v53  ;;  %v2585_v61 = vrot.slane %v198_v55, %v2532_v3  ;;  %v2608_v39 = vsub.s32 %v325_v28, %v2528_v1 }
  0x45   :  { %v2579_v56 = vrot.slane %v199_v49, %v2532_v3  ;;  %2057 = vmatpush3.bf16.msra.mxu0 %v2249_v51 }
  0x46   :  { %123 = vbcast.lane.b32.xlu1 %v2554_v25, 256  ;;  %112 = vbcast.lane.b32.xlu0 %v2556_v26, 256  ;;  %v2590_v0 = vrot.slane %v200_v60, %v2532_v3  ;;  %v2262_v3 = vld [vmem:[#allocation8 + $0x30] sm:$0xff]  }
  0x47   :  { %2079 = vmatpush3.bf16.msra.mxu1 %v2250_v52  ;;  %2058 = vmatprep.subr.bf16.mxu0 %v2252_v57 }
  0x48   :  { %2080 = vmatprep.subr.bf16.mxu1 %v2253_v59 }
  0x49   :  { %2059 = vmatpush3.bf16.msra.mxu0 %v2254_v62 }
  0x4a   :  { %145 = vbcast.lane.b32.xlu1 %v2558_v33, 256  ;;  %134 = vbcast.lane.b32.xlu0 %v2560_v34, 256 }
  0x4b   :  { %2081 = vmatpush3.bf16.msra.mxu1 %v2255_v63  ;;  %2060 = vmatprep.subr.bf16.mxu0 %v2256_v2 }
  0x4c   :  { %2082 = vmatprep.subr.bf16.mxu1 %v2257_v4 }
  0x4d   :  { %2061 = vmatpush3.bf16.msra.mxu0 %v2258_v5 }
  0x4e   :  { %83 = vbcast.lane.b32.xlu1 %v2547_v17, 264  ;;  %72 = vbcast.lane.b32.xlu0 %v2539_v10, 264  ;;  %v2263_v10 = vld [vmem:[#allocation8 + $0xb0] sm:$0xff]  }
  0x4f   :  { %2083 = vmatpush3.bf16.msra.mxu1 %v2259_v6  ;;  %2062 = vmatprep.subr.bf16.mxu0 %v2260_v7 }
  0x50   :  { %2084 = vmatprep.subr.bf16.mxu1 %v2261_v8 }
  0x51   :  { %2063 = vmatpush3.bf16.msra.mxu0 %v2262_v3 }
  0x52   :  { %105 = vbcast.lane.b32.xlu1 %v2545_v16, 264  ;;  %94 = vbcast.lane.b32.xlu0 %v2536_v9, 264  ;;  %v2265_v9 = vld [vmem:[#allocation8 + $0xf8] sm:$0xff]   ;;  %v2464_v16 = vmov 1983009808  }
  0x53   :  { %2085 = vmatpush3.bf16.msra.mxu1 %v2263_v10  ;;  %2064 = vmatprep.subr.bf16.mxu0 %v2264_v11  ;;  %v260_v17 = vunpack.c.l.s4 %v2464_v16 }
  0x54   :  { %2086 = vmatprep.subr.bf16.mxu1 %v2265_v9 }
  0x55   :  { %2065 = vmatpush3.bf16.msra.mxu0 %v2266_v12  ;;  %v261_v18 = vunpack.c.0.s8 %v260_v17 }
  0x56   :  { %127 = vbcast.lane.b32.xlu1 %v2554_v25, 264  ;;  %116 = vbcast.lane.b32.xlu0 %v2556_v26, 264 }
  0x57   :  { %2087 = vmatpush3.bf16.msra.mxu1 %v2267_v13  ;;  %2094 = vmatprep.subr.bf16.mxu0 %v2268_v14  ;;  %v2599_v23 = vsub.s32 %v261_v18, %v2528_v1 }
  0x58   :  { %2116 = vmatprep.subr.bf16.mxu1 %v2269_v15 }
  0x5a   :  { %149 = vbcast.lane.b32.xlu1 %v2558_v33, 264  ;;  %138 = vbcast.lane.b32.xlu0 %v2560_v34, 264 }
  0xb0   :  { %v91_v21 = vpop.permute.xlu1 %90  ;;  %v69_v22 = vpop.permute.xlu0 %68 }
  0xb1   :  { %v245_v24 = vmul.f32 %v2570_v48, %v91_v21  ;;  %v241_v25 = vmul.f32 %v2565_v42, %v69_v22 }
  0xb3   :  { %v257_v26 = vcombine.low %v241_v25, %v245_v24  ;;  %v258_v27 = vcombine.high %v241_v25, %v245_v24 }
  0xb4   :  { %v102_v29 = vpop.permute.xlu1 %101  ;;  %v80_v30 = vpop.permute.xlu0 %79 }
  0xb5   :  { %v265_v31 = vrot.slane %v257_v26, %v2599_v23  ;;  %v272_v32 = vrot.slane %v258_v27, %v2599_v23  ;;  %v247_v33 = vmul.f32 %v2579_v56, %v102_v29  ;;  %v243_v34 = vmul.f32 %v2573_v50, %v80_v30 }
  0xb7   :  { %v273_v35 = vcombine.low %v243_v34, %v247_v33  ;;  %v274_v36 = vcombine.high %v243_v34, %v247_v33 }
  0xb8   :  { %v124_v37 = vpop.permute.xlu1 %123  ;;  %v113_v38 = vpop.permute.xlu0 %112 }
  0xb9   :  { %v281_v40 = vrot.slane %v273_v35, %v2599_v23  ;;  %v288_v41 = vrot.slane %v274_v36, %v2599_v23  ;;  %v251_v47 = vmul.f32 %v2582_v58, %v124_v37  ;;  %v249_v49 = vmul.f32 %v2576_v54, %v113_v38  ;;  %v2270_v38 = vld [vmem:[#allocation8 + $0x100] sm:$0xff]  }
  0xbb   :  { %v337_v43 = vcombine.low %v272_v32, %v288_v41  ;;  %v338_v44 = vcombine.high %v272_v32, %v288_v41  ;;  %v321_v45 = vcombine.low %v265_v31, %v281_v40  ;;  %v322_v46 = vcombine.high %v265_v31, %v281_v40 }
  0xbc   :  { %v146_v51 = vpop.permute.xlu1 %145  ;;  %v135_v52 = vpop.permute.xlu0 %134 }
  0xbd   :  { %v255_v53 = vmul.f32 %v2590_v0, %v146_v51  ;;  %v253_v55 = vmul.f32 %v2585_v61, %v135_v52  ;;  %v329_v1 = vrot.slane %v321_v45, %v2608_v39  ;;  %v336_v57 = vrot.slane %v322_v46, %v2608_v39 }
  0xbe   :  { %v345_v59 = vrot.slane %v337_v43, %v2608_v39  ;;  %v352_v60 = vrot.slane %v338_v44, %v2608_v39  ;;  %v2272_v43 = vld [vmem:[#allocation8 + $0x148] sm:$0xff]  }
  0xbf   :  { %v305_v62 = vcombine.low %v251_v47, %v255_v53  ;;  %v306_v63 = vcombine.high %v251_v47, %v255_v53  ;;  %v289_v2 = vcombine.low %v249_v49, %v253_v55  ;;  %v290_v4 = vcombine.high %v249_v49, %v253_v55  ;;  %v2273_v44 = vld [vmem:[#allocation8 + $0x1c8] sm:$0xff]  }
  0xc0   :  { %v84_v5 = vpop.permute.xlu1 %83  ;;  %v73_v6 = vpop.permute.xlu0 %72 }
  0xc1   :  { %v313_v7 = vrot.slane %v305_v62, %v2599_v23  ;;  %v320_v8 = vrot.slane %v306_v63, %v2599_v23  ;;  %v297_v3 = vrot.slane %v289_v2, %v2599_v23  ;;  %v304_v10 = vrot.slane %v290_v4, %v2599_v23  ;;  %v2277_v2 = vld [vmem:[#allocation8 + $0x1d0] sm:$0xff]  }
  0xc2   :  { %v244_v14 = vmul.f32 %v2573_v50, %v84_v5  ;;  %v242_v21 = vmul.f32 %v2565_v42, %v73_v6  ;;  %v2271_v42 = vld [vmem:[#allocation8 + $0x180] sm:$0xff]  }
  0xc3   :  { %v369_v11 = vcombine.low %v304_v10, %v320_v8  ;;  %v370_v9 = vcombine.high %v304_v10, %v320_v8  ;;  %v353_v12 = vcombine.low %v297_v3, %v313_v7  ;;  %v354_v13 = vcombine.high %v297_v3, %v313_v7  ;;  %v2278_v10 = vld [vmem:[#allocation8 + $0x110] sm:$0xff]  }
  0xc4   :  { %v106_v15 = vpop.permute.xlu1 %105  ;;  %v95_v16 = vpop.permute.xlu0 %94 }
  0xc5   :  { %v361_v17 = vrot.slane %v353_v12, %v2608_v39  ;;  %v368_v18 = vrot.slane %v354_v13, %v2608_v39  ;;  %v377_v19 = vrot.slane %v369_v11, %v2608_v39  ;;  %v384_v20 = vrot.slane %v370_v9, %v2608_v39  ;;  %v2279_v11 = vld [vmem:[#allocation8 + $0x190] sm:$0xff]   ;;  %v2281_v13 = vld [vmem:[#allocation8 + $0x1d8] sm:$0xff]  }
  0xc6   :  { %v248_v22 = vmul.f32 %v2579_v56, %v106_v15  ;;  %v246_v24 = vmul.f32 %v2570_v48, %v95_v16 }
  0xc7   :  { %v386_v25 = vcombine.high %v329_v1, %v361_v17  ;;  %v388_v26 = vcombine.high %v336_v57, %v368_v18  ;;  %v385_v27 = vcombine.low %v329_v1, %v361_v17  ;;  %v387_v50 = vcombine.low %v336_v57, %v368_v18  ;;  %v2274_v1 = vld [vmem:[#allocation8 + $0x108] sm:$0xff]  }
  0xc8   :  { %v390_v28 = vcombine.high %v345_v59, %v377_v19  ;;  %v392_v29 = vcombine.high %v352_v60, %v384_v20  ;;  %v409_v30 = vcombine.low %v244_v14, %v248_v22  ;;  %v410_v31 = vcombine.high %v244_v14, %v248_v22  ;;  %v128_v32 = vpop.permute.xlu1 %127  ;;  %v117_v33 = vpop.permute.xlu0 %116  ;;  %v2275_v57 = vld [vmem:[#allocation8 + $0x188] sm:$0xff]   ;;  %v2282_v22 = vld [vmem:[#allocation8 + $0x118] sm:$0xff]  }
  0xc9   :  { %v531_v34 = vpack.c.bf16 %v386_v25, %v386_v25  ;;  %v533_v35 = vpack.c.bf16 %v388_v26, %v388_v26  ;;  %v530_v36 = vpack.c.bf16 %v385_v27, %v385_v27  ;;  %v532_v37 = vpack.c.bf16 %v387_v50, %v387_v50  ;;  %v2284_v27 = vld [vmem:[#allocation8 + $0x160] sm:$0xff]  }
  0xca   :  { %v535_v40 = vpack.c.bf16 %v390_v28, %v390_v28  ;;  %v537_v56 = vpack.c.bf16 %v392_v29, %v392_v29  ;;  %v417_v48 = vrot.slane %v409_v30, %v2599_v23  ;;  %v424_v41 = vrot.slane %v410_v31, %v2599_v23  ;;  %v2285_v50 = vld [vmem:[#allocation8 + $0x1e0] sm:$0xff]  }
  0xcb   :  { %1602 = vmatprep.mubr.bf16.mxu0 %v531_v34  ;;  %1642 = vmatprep.mubr.bf16.mxu1 %v533_v35  ;;  %v393_v45 = vcombine.low %v242_v21, %v246_v24  ;;  %v394_v46 = vcombine.high %v242_v21, %v246_v24  ;;  %v2634_v47 = vcombine.low %v345_v59, %v377_v19  ;;  %v2276_v59 = vld [vmem:[#allocation8 + $0x150] sm:$0xff]   ;;  %v2283_v24 = vld [vmem:[#allocation8 + $0x198] sm:$0xff]   ;;  %v2286_v35 = vld [vmem:[#allocation8 + $0x120] sm:$0xff]  }
  0xcc   :  { %1603 = vmatmul.mubr.bf16.vlgmr.msra.gmra.mrb[0].mxu0 %v530_v36  ;;  %1643 = vmatmul.mubr.bf16.vlgmr.msra.gmra.mrb[0].mxu1 %v532_v37  ;;  %v2636_v49 = vcombine.low %v352_v60, %v384_v20  ;;  %v252_v51 = vmul.f32 %v2582_v58, %v128_v32  ;;  %v250_v52 = vmul.f32 %v2576_v54, %v117_v33  ;;  %v150_v53 = vpop.permute.xlu1 %149  ;;  %v139_v55 = vpop.permute.xlu0 %138  ;;  %v2287_v36 = vld [vmem:[#allocation8 + $0x1a0] sm:$0xff]  }
  0xcd   :  { %2095 = vmatpush3.bf16.msra.mxu0 %v2270_v38  ;;  %2117 = vmatpush3.bf16.msra.mxu1 %v2271_v42  ;;  %v401_v62 = vrot.slane %v393_v45, %v2599_v23  ;;  %v408_v63 = vrot.slane %v394_v46, %v2599_v23  ;;  %v256_v60 = vmul.f32 %v2590_v0, %v150_v53  ;;  %v2294_v45 = vld [vmem:[#allocation8 + $0x130] sm:$0xff]   ;;  %v2298_v53 = vld [vmem:[#allocation8 + $0x138] sm:$0xff]  }
  0xce   :  { %1682 = vmatprep.mubr.bf16.mxu0 %v535_v40  ;;  %1722 = vmatprep.mubr.bf16.mxu1 %v537_v56  ;;  %v254_v58 = vmul.f32 %v2585_v61, %v139_v55  ;;  %v2280_v61 = vld [vmem:[#allocation8 + $0x158] sm:$0xff]   ;;  %v2288_v40 = vld [vmem:[#allocation8 + $0x168] sm:$0xff]   ;;  %v2295_v46 = vld [vmem:[#allocation8 + $0x1b0] sm:$0xff]  }
  0xcf   :  { %2096 = vmatprep.subr.bf16.mxu0 %v2272_v43  ;;  %2118 = vmatprep.subr.bf16.mxu1 %v2273_v44  ;;  %v457_v54 = vcombine.low %v401_v62, %v417_v48  ;;  %v458_v4 = vcombine.high %v401_v62, %v417_v48  ;;  %v473_v5 = vcombine.low %v408_v63, %v424_v41  ;;  %v2290_v48 = vld [vmem:[#allocation8 + $0x128] sm:$0xff]   ;;  %v2292_v43 = vld [vmem:[#allocation8 + $0x170] sm:$0xff]   ;;  %v2299_v55 = vld [vmem:[#allocation8 + $0x1b8] sm:$0xff]  }
  0xd0   :  { %v474_v6 = vcombine.high %v408_v63, %v424_v41  ;;  %v441_v7 = vcombine.low %v252_v51, %v256_v60  ;;  %v442_v8 = vcombine.high %v252_v51, %v256_v60  ;;  %v425_v3 = vcombine.low %v250_v52, %v254_v58  ;;  %v2291_v41 = vld [vmem:[#allocation8 + $0x1a8] sm:$0xff]   ;;  %v2293_v44 = vld [vmem:[#allocation8 + $0x1f0] sm:$0xff]   ;;  %v2296_v51 = vld [vmem:[#allocation8 + $0x178] sm:$0xff]  }
  0xd1   :  { %2097 = vmatpush3.bf16.msra.mxu0 %v2274_v1  ;;  %2119 = vmatpush3.bf16.msra.mxu1 %v2275_v57  ;;  %v426_v9 = vcombine.high %v250_v52, %v254_v58  ;;  %v465_v12 = vrot.slane %v457_v54, %v2608_v39  ;;  %v472_v0 = vrot.slane %v458_v4, %v2608_v39  ;;  %v2297_v52 = vld [vmem:[#allocation8 + $0x1f8] sm:$0xff]   ;;  %v2300_v1 = vld [vmem:[#allocation8 + $0x240] sm:$0xff]   ;;  %v2304_v60 = vld [vmem:[#allocation8 + $0x248] sm:$0xff]  }
  0xd2   :  { %2098 = vmatprep.subr.bf16.mxu0 %v2276_v59  ;;  %2120 = vmatprep.subr.bf16.mxu1 %v2277_v2  ;;  %v449_v14 = vrot.slane %v441_v7, %v2599_v23  ;;  %v456_v15 = vrot.slane %v442_v8, %v2599_v23  ;;  %v433_v16 = vrot.slane %v425_v3, %v2599_v23  ;;  %v2301_v57 = vld [vmem:[#allocation8 + $0x2c0] sm:$0xff]   ;;  %v2305_v58 = vld [vmem:[#allocation8 + $0x2c8] sm:$0xff]   ;;  %v2308_v7 = vld [vmem:[#allocation8 + $0x250] sm:$0xff]  }
  0xd3   :  { %v440_v17 = vrot.slane %v426_v9, %v2599_v23  ;;  %v481_v18 = vrot.slane %v473_v5, %v2608_v39  ;;  %v488_v19 = vrot.slane %v474_v6, %v2608_v39  ;;  %v2302_v62 = vld [vmem:[#allocation8 + $0x200] sm:$0xff]   ;;  %v534_v59 = vpack.c.bf16 %v2634_v47, %v2634_v47  ;;  %v2306_v5 = vld [vmem:[#allocation8 + $0x208] sm:$0xff]   ;;  %v2309_v8 = vld [vmem:[#allocation8 + $0x2d0] sm:$0xff]  }
  0xd4   :  { %v489_v20 = vcombine.low %v433_v16, %v449_v14  ;;  %v490_v21 = vcombine.high %v433_v16, %v449_v14  ;;  %v2303_v63 = vld [vmem:[#allocation8 + $0x280] sm:$0xff]   ;;  %v536_v2 = vpack.c.bf16 %v2636_v49, %v2636_v49  ;;  %v2307_v6 = vld [vmem:[#allocation8 + $0x288] sm:$0xff]   ;;  %v2310_v47 = vld [vmem:[#allocation8 + $0x210] sm:$0xff]  }
  0xd5   :  { %2099 = vmatpush3.bf16.msra.mxu0 %v2278_v10  ;;  %2121 = vmatpush3.bf16.msra.mxu1 %v2279_v11  ;;  %v505_v25 = vcombine.low %v440_v17, %v456_v15  ;;  %v506_v26 = vcombine.high %v440_v17, %v456_v15  ;;  %v2311_v49 = vld [vmem:[#allocation8 + $0x290] sm:$0xff]   ;;  %v2312_v3 = vld [vmem:[#allocation8 + $0x258] sm:$0xff]   ;;  %v2320_v14 = vld [vmem:[#allocation8 + $0x268] sm:$0xff]  }
  0xd6   :  { %2100 = vmatprep.subr.bf16.mxu0 %v2280_v61  ;;  %2122 = vmatprep.subr.bf16.mxu1 %v2281_v13  ;;  %v497_v28 = vrot.slane %v489_v20, %v2608_v39  ;;  %v504_v23 = vrot.slane %v490_v21, %v2608_v39  ;;  %v2313_v10 = vld [vmem:[#allocation8 + $0x2d8] sm:$0xff]   ;;  %v2318_v61 = vld [vmem:[#allocation8 + $0x220] sm:$0xff]   ;;  %v2321_v15 = vld [vmem:[#allocation8 + $0x2e8] sm:$0xff]  }
  0xd7   :  { %v513_v29 = vrot.slane %v505_v25, %v2608_v39  ;;  %v520_v30 = vrot.slane %v506_v26, %v2608_v39  ;;  %v2289_v39 = vld [vmem:[#allocation8 + $0x1e8] sm:$0xff]   ;;  %v2314_v11 = vld [vmem:[#allocation8 + $0x218] sm:$0xff]   ;;  %v2319_v13 = vld [vmem:[#allocation8 + $0x2a0] sm:$0xff]  }
  0xd8   :  { %v522_v31 = vcombine.high %v465_v12, %v497_v28  ;;  %v524_v32 = vcombine.high %v472_v0, %v504_v23  ;;  %v2656_v33 = vcombine.low %v465_v12, %v497_v28  ;;  %v2658_v34 = vcombine.low %v472_v0, %v504_v23  ;;  %v2315_v9 = vld [vmem:[#allocation8 + $0x298] sm:$0xff]   ;;  %v2316_v12 = vld [vmem:[#allocation8 + $0x260] sm:$0xff]   ;;  %v2322_v16 = vld [vmem:[#allocation8 + $0x228] sm:$0xff]  }
  0xd9   :  { %2101 = vmatpush3.bf16.msra.mxu0 %v2282_v22  ;;  %2123 = vmatpush3.bf16.msra.mxu1 %v2283_v24  ;;  %v2660_v37 = vcombine.high %v481_v18, %v513_v29  ;;  %v2662_v38 = vcombine.high %v488_v19, %v520_v30  ;;  %v2664_v42 = vcombine.low %v481_v18, %v513_v29  ;;  %v2317_v0 = vld [vmem:[#allocation8 + $0x2e0] sm:$0xff]   ;;  %v2323_v17 = vld [vmem:[#allocation8 + $0x2a8] sm:$0xff]   ;;  %v2324_v18 = vld [vmem:[#allocation8 + $0x270] sm:$0xff]  }
  0xda   :  { %2102 = vmatprep.subr.bf16.mxu0 %v2284_v27  ;;  %2124 = vmatprep.subr.bf16.mxu1 %v2285_v50  ;;  %v2666_v56 = vcombine.low %v488_v19, %v520_v30  ;;  %v539_v54 = vpack.c.bf16 %v522_v31, %v522_v31  ;;  %v541_v4 = vpack.c.bf16 %v524_v32, %v524_v32  ;;  %v2325_v19 = vld [vmem:[#allocation8 + $0x2f0] sm:$0xff]   ;;  %v2328_v22 = vld [vmem:[#allocation8 + $0x278] sm:$0xff]   ;;  %v2332_v27 = vld [vmem:[#allocation8 + $0x340] sm:$0xff]  }
  0xdb   :  { %v2326_v20 = vld [vmem:[#allocation8 + $0x230] sm:$0xff]   ;;  %v2329_v24 = vld [vmem:[#allocation8 + $0x2f8] sm:$0xff]   ;;  %v2333_v50 = vld [vmem:[#allocation8 + $0x3c0] sm:$0xff]   ;;  %v538_v23 = vpack.c.bf16 %v2656_v33, %v2656_v33  ;;  %v540_v29 = vpack.c.bf16 %v2658_v34, %v2658_v34  ;;  %v543_v31 = vpack.c.bf16 %v2660_v37, %v2660_v37 }
  0xdc   :  { %v2327_v21 = vld [vmem:[#allocation8 + $0x2b0] sm:$0xff]   ;;  %v2330_v25 = vld [vmem:[#allocation8 + $0x238] sm:$0xff]   ;;  %v2334_v28 = vld [vmem:[#allocation8 + $0x300] sm:$0xff]  }
  0xdd   :  { %2103 = vmatpush3.bf16.msra.mxu0 %v2286_v35  ;;  %2125 = vmatpush3.bf16.msra.mxu1 %v2287_v36  ;;  %v2331_v26 = vld [vmem:[#allocation8 + $0x2b8] sm:$0xff]   ;;  %v2335_v30 = vld [vmem:[#allocation8 + $0x380] sm:$0xff]   ;;  %v2336_v32 = vld [vmem:[#allocation8 + $0x348] sm:$0xff]   ;;  %v545_v36 = vpack.c.bf16 %v2662_v38, %v2662_v38 }
  0xde   :  { %2104 = vmatprep.subr.bf16.mxu0 %v2288_v40  ;;  %2126 = vmatprep.subr.bf16.mxu1 %v2289_v39  ;;  %v2337_v35 = vld [vmem:[#allocation8 + $0x3c8] sm:$0xff]   ;;  %v2340_v34 = vld [vmem:[#allocation8 + $0x350] sm:$0xff]   ;;  %v2346_v38 = vld [vmem:[#allocation8 + $0x318] sm:$0xff]  }
  0xdf   :  { %v2338_v40 = vld [vmem:[#allocation8 + $0x308] sm:$0xff]   ;;  %v2341_v39 = vld [vmem:[#allocation8 + $0x3d0] sm:$0xff]  }
  0xe0   :  { %v2339_v33 = vld [vmem:[#allocation8 + $0x388] sm:$0xff]   ;;  %v2343_v37 = vld [vmem:[#allocation8 + $0x390] sm:$0xff]  }
  0xe1   :  { %2105 = vmatpush3.bf16.msra.mxu0 %v2290_v48  ;;  %2127 = vmatpush3.bf16.msra.mxu1 %v2291_v41  ;;  %v2342_v48 = vld [vmem:[#allocation8 + $0x310] sm:$0xff]   ;;  %v2344_v41 = vld [vmem:[#allocation8 + $0x358] sm:$0xff]  }
  0xe2   :  { %2106 = vmatprep.subr.bf16.mxu0 %v2292_v43  ;;  %2128 = vmatprep.subr.bf16.mxu1 %v2293_v44  ;;  %v2345_v43 = vld [vmem:[#allocation8 + $0x3d8] sm:$0xff]  }
  0xe3   :  { %v2347_v44 = vld [vmem:[#allocation8 + $0x398] sm:$0xff]  }
  0xe5   :  { %2107 = vmatpush3.bf16.msra.mxu0 %v2294_v45  ;;  %2129 = vmatpush3.bf16.msra.mxu1 %v2295_v46  ;;  %v2348_v45 = vld [vmem:[#allocation8 + $0x360] sm:$0xff]  }
  0xe6   :  { %2108 = vmatprep.subr.bf16.mxu0 %v2296_v51  ;;  %2130 = vmatprep.subr.bf16.mxu1 %v2297_v52  ;;  %v2349_v46 = vld [vmem:[#allocation8 + $0x3e0] sm:$0xff]  }
  0xe7   :  { %v2350_v51 = vld [vmem:[#allocation8 + $0x320] sm:$0xff]  }
  0xe8   :  { %v2351_v52 = vld [vmem:[#allocation8 + $0x3a0] sm:$0xff]  }
  0xe9   :  { %2109 = vmatpush3.bf16.msra.mxu0 %v2298_v53  ;;  %2131 = vmatpush3.bf16.msra.mxu1 %v2299_v55  ;;  %v2352_v53 = vld [vmem:[#allocation8 + $0x368] sm:$0xff]  }
  0xea   :  { %2138 = vmatprep.subr.bf16.mxu0 %v2300_v1  ;;  %2160 = vmatprep.subr.bf16.mxu1 %v2301_v57  ;;  %v2353_v55 = vld [vmem:[#allocation8 + $0x3e8] sm:$0xff]  }
  0xeb   :  { %v2354_v1 = vld [vmem:[#allocation8 + $0x328] sm:$0xff]  }
  0xec   :  { %1683 = vmatmul.mubr.bf16.vlgmr.msra.gmra.mrb[4].mxu0 %v534_v59  ;;  %1723 = vmatmul.mubr.bf16.vlgmr.msra.gmra.mrb[4].mxu1 %v536_v2  ;;  %v2355_v57 = vld [vmem:[#allocation8 + $0x3a8] sm:$0xff]   ;;  %v2358_v59 = vld [vmem:[#allocation8 + $0x330] sm:$0xff]  }
  0xed   :  { %2139 = vmatpush3.bf16.msra.mxu0 %v2302_v62  ;;  %2161 = vmatpush3.bf16.msra.mxu1 %v2303_v63  ;;  %v2356_v62 = vld [vmem:[#allocation8 + $0x370] sm:$0xff]  }
  0xee   :  { %2140 = vmatprep.subr.bf16.mxu0 %v2304_v60  ;;  %2162 = vmatprep.subr.bf16.mxu1 %v2305_v58  ;;  %v2357_v63 = vld [vmem:[#allocation8 + $0x3f0] sm:$0xff]   ;;  %v2360_v60 = vld [vmem:[#allocation8 + $0x378] sm:$0xff]  }
  0xef   :  { %1762 = vmatprep.mubr.bf16.mxu0 %v539_v54  ;;  %1802 = vmatprep.mubr.bf16.mxu1 %v541_v4  ;;  %v2359_v2 = vld [vmem:[#allocation8 + $0x3b0] sm:$0xff]   ;;  %v2361_v58 = vld [vmem:[#allocation8 + $0x3f8] sm:$0xff]  }
  0xf0   :  { %v2362_v54 = vld [vmem:[#allocation8 + $0x338] sm:$0xff]  }
  0xf1   :  { %2141 = vmatpush3.bf16.msra.mxu0 %v2306_v5  ;;  %2163 = vmatpush3.bf16.msra.mxu1 %v2307_v6  ;;  %v2363_v4 = vld [vmem:[#allocation8 + $0x3b8] sm:$0xff]   ;;  %v542_v5 = vpack.c.bf16 %v2664_v42, %v2664_v42  ;;  %v544_v6 = vpack.c.bf16 %v2666_v56, %v2666_v56 }
  0xf2   :  { %2142 = vmatprep.subr.bf16.mxu0 %v2308_v7  ;;  %2164 = vmatprep.subr.bf16.mxu1 %v2309_v8 }
  0xf5   :  { %2143 = vmatpush3.bf16.msra.mxu0 %v2310_v47  ;;  %2165 = vmatpush3.bf16.msra.mxu1 %v2311_v49 }
  0xf6   :  { %2144 = vmatprep.subr.bf16.mxu0 %v2312_v3  ;;  %2166 = vmatprep.subr.bf16.mxu1 %v2313_v10 }
  0xf9   :  { %2145 = vmatpush3.bf16.msra.mxu0 %v2314_v11  ;;  %2167 = vmatpush3.bf16.msra.mxu1 %v2315_v9 }
  0xfa   :  { %2146 = vmatprep.subr.bf16.mxu0 %v2316_v12  ;;  %2168 = vmatprep.subr.bf16.mxu1 %v2317_v0 }
  0xfd   :  { %2147 = vmatpush3.bf16.msra.mxu0 %v2318_v61  ;;  %2169 = vmatpush3.bf16.msra.mxu1 %v2319_v13 }
  0xfe   :  { %2148 = vmatprep.subr.bf16.mxu0 %v2320_v14  ;;  %2170 = vmatprep.subr.bf16.mxu1 %v2321_v15 }
 0x101   :  { %2149 = vmatpush3.bf16.msra.mxu0 %v2322_v16  ;;  %2171 = vmatpush3.bf16.msra.mxu1 %v2323_v17 }
 0x102   :  { %2150 = vmatprep.subr.bf16.mxu0 %v2324_v18  ;;  %2172 = vmatprep.subr.bf16.mxu1 %v2325_v19 }
 0x105   :  { %2151 = vmatpush3.bf16.msra.mxu0 %v2326_v20  ;;  %2173 = vmatpush3.bf16.msra.mxu1 %v2327_v21 }
 0x106   :  { %2152 = vmatprep.subr.bf16.mxu0 %v2328_v22  ;;  %2174 = vmatprep.subr.bf16.mxu1 %v2329_v24 }
 0x109   :  { %2153 = vmatpush3.bf16.msra.mxu0 %v2330_v25  ;;  %2175 = vmatpush3.bf16.msra.mxu1 %v2331_v26 }
 0x10a   :  { %2182 = vmatprep.subr.bf16.mxu0 %v2332_v27  ;;  %2204 = vmatprep.subr.bf16.mxu1 %v2333_v50 }
 0x10c   :  { %1763 = vmatmul.mubr.bf16.vlgmr.msra.gmra.mrb[8].mxu0 %v538_v23  ;;  %1803 = vmatmul.mubr.bf16.vlgmr.msra.gmra.mrb[8].mxu1 %v540_v29 }
 0x10d   :  { %2183 = vmatpush3.bf16.msra.mxu0 %v2334_v28  ;;  %1842 = vmatprep.mubr.bf16.mxu0 %v543_v31 }
 0x10e   :  { %2205 = vmatpush3.bf16.msra.mxu1 %v2335_v30  ;;  %1882 = vmatprep.mubr.bf16.mxu1 %v545_v36 }
 0x10f   :  { %2184 = vmatprep.subr.bf16.mxu0 %v2336_v32  ;;  %2206 = vmatprep.subr.bf16.mxu1 %v2337_v35 }
 0x111   :  { %2185 = vmatpush3.bf16.msra.mxu0 %v2338_v40 }
 0x112   :  { %2207 = vmatpush3.bf16.msra.mxu1 %v2339_v33  ;;  %2186 = vmatprep.subr.bf16.mxu0 %v2340_v34 }
 0x113   :  { %2208 = vmatprep.subr.bf16.mxu1 %v2341_v39 }
 0x115   :  { %2187 = vmatpush3.bf16.msra.mxu0 %v2342_v48 }
 0x116   :  { %2209 = vmatpush3.bf16.msra.mxu1 %v2343_v37  ;;  %2188 = vmatprep.subr.bf16.mxu0 %v2344_v41 }
 0x117   :  { %2210 = vmatprep.subr.bf16.mxu1 %v2345_v43 }
 0x119   :  { %2189 = vmatpush3.bf16.msra.mxu0 %v2346_v38 }
 0x11a   :  { %2211 = vmatpush3.bf16.msra.mxu1 %v2347_v44  ;;  %2190 = vmatprep.subr.bf16.mxu0 %v2348_v45  ;;  %v2049_v45 = vld [vmem:[%s2702_s3] ss:$0 sm:$0xff] }
 0x11b   :  { %2212 = vmatprep.subr.bf16.mxu1 %v2349_v46 }
 0x11d   :  { %2191 = vmatpush3.bf16.msra.mxu0 %v2350_v51 }
 0x11e   :  { %2213 = vmatpush3.bf16.msra.mxu1 %v2351_v52  ;;  %2192 = vmatprep.subr.bf16.mxu0 %v2352_v53 }
 0x11f   :  { %2214 = vmatprep.subr.bf16.mxu1 %v2353_v55 }
 0x121   :  { %2193 = vmatpush3.bf16.msra.mxu0 %v2354_v1 }
 0x122   :  { %2215 = vmatpush3.bf16.msra.mxu1 %v2355_v57  ;;  %2194 = vmatprep.subr.bf16.mxu0 %v2356_v62 }
 0x123   :  { %2216 = vmatprep.subr.bf16.mxu1 %v2357_v63 }
 0x125   :  { %2195 = vmatpush3.bf16.msra.mxu0 %v2358_v59 }
 0x126   :  { %2217 = vmatpush3.bf16.msra.mxu1 %v2359_v2  ;;  %2196 = vmatprep.subr.bf16.mxu0 %v2360_v60 }
 0x127   :  { %2218 = vmatprep.subr.bf16.mxu1 %v2361_v58 }
 0x129   :  { %2197 = vmatpush3.bf16.msra.mxu0 %v2362_v54 }
 0x12a   :  { %2219 = vmatpush3.bf16.msra.mxu1 %v2363_v4 }
 0x12c   :  { %1843 = vmatmul.mubr.bf16.vlgmr.msra.gmra.mrb[12].mxu0 %v542_v5 }
 0x12d   :  { %1883 = vmatmul.mubr.bf16.vlgmr.msra.gmra.mrb[12].mxu1 %v544_v6 }
 0x19f   :  { %v2066_v7 = vpop.f32.mrb[0].mxu0  ;;  %v2088_v8 = vpop.f32.mrb[0].mxu1 }
 0x1a0   :  { %v2067_v47 = vpop.f32.mrb[1].mxu0  ;;  %v2089_v49 = vpop.f32.mrb[1].mxu1 }
 0x1a1   :  { %v2068_v3 = vadd.f32 %v2067_v47, %v2066_v7  ;;  %v2090_v10 = vadd.f32 %v2089_v49, %v2088_v8  ;;  %v2069_v11 = vpop.f32.mrb[2].mxu0  ;;  %v2091_v9 = vpop.f32.mrb[2].mxu1 }
 0x1a2   :  { %v2070_v12 = vpop.f32.mrb[3].mxu0  ;;  %v2092_v0 = vpop.f32.mrb[3].mxu1 }
 0x1a3   :  { %v1645_v61 = vadd.f32 %v2090_v10, %v2068_v3 }
 0x1bf   :  { %v2110_v13 = vpop.f32.mrb[4].mxu0  ;;  %v2132_v14 = vpop.f32.mrb[4].mxu1 }
 0x1c0   :  { %v2111_v15 = vpop.f32.mrb[5].mxu0  ;;  %v2133_v42 = vpop.f32.mrb[5].mxu1 }
 0x1c1   :  { %v2112_v16 = vadd.f32 %v2111_v15, %v2110_v13  ;;  %v2134_v17 = vadd.f32 %v2133_v42, %v2132_v14  ;;  %v2113_v56 = vpop.f32.mrb[6].mxu0  ;;  %v2135_v18 = vpop.f32.mrb[6].mxu1 }
 0x1c2   :  { %v2114_v19 = vpop.f32.mrb[7].mxu0  ;;  %v2136_v20 = vpop.f32.mrb[7].mxu1 }
 0x1c3   :  { %v1685_v21 = vadd.f32 %v2112_v16, %v1645_v61 }
 0x1c5   :  { %v1725_v22 = vadd.f32 %v2134_v17, %v1685_v21 }
 0x1df   :  { %v2154_v24 = vpop.f32.mrb[8].mxu0  ;;  %v2176_v25 = vpop.f32.mrb[8].mxu1 }
 0x1e0   :  { %v2155_v26 = vpop.f32.mrb[9].mxu0  ;;  %v2177_v27 = vpop.f32.mrb[9].mxu1 }
 0x1e1   :  { %v2156_v50 = vadd.f32 %v2155_v26, %v2154_v24  ;;  %v2178_v28 = vadd.f32 %v2177_v27, %v2176_v25  ;;  %v2157_v23 = vpop.f32.mrb[10].mxu0  ;;  %v2179_v29 = vpop.f32.mrb[10].mxu1 }
 0x1e2   :  { %v2158_v30 = vpop.f32.mrb[11].mxu0  ;;  %v2180_v31 = vpop.f32.mrb[11].mxu1 }
 0x1e3   :  { %v1765_v32 = vadd.f32 %v2156_v50, %v1725_v22 }
 0x1e5   :  { %v1805_v35 = vadd.f32 %v2178_v28, %v1765_v32 }
 0x1ff   :  { %v2198_v36 = vpop.f32.mrb[12].mxu0 }
 0x200   :  { %v2220_v40 = vpop.f32.mrb[12].mxu1  ;;  %v2199_v33 = vpop.f32.mrb[13].mxu0 }
 0x201   :  { %v2200_v34 = vadd.f32 %v2199_v33, %v2198_v36  ;;  %v2221_v39 = vpop.f32.mrb[13].mxu1  ;;  %v2201_v48 = vpop.f32.mrb[14].mxu0 }
 0x202   :  { %v2222_v37 = vadd.f32 %v2221_v39, %v2220_v40  ;;  %v2223_v41 = vpop.f32.mrb[14].mxu1  ;;  %v2202_v43 = vpop.f32.mrb[15].mxu0 }
 0x203   :  { %v1845_v38 = vadd.f32 %v2200_v34, %v1805_v35  ;;  %v2224_v44 = vpop.f32.mrb[15].mxu1 }
 0x205   :  { %v1885_v46 = vadd.f32 %v2222_v37, %v1845_v38 }
 0x207   :  { %v1903_v51 = vadd.f32 %v2049_v45, %v1885_v46 }
 0x209   :  { %1904 = vst [vmem:[#allocation9] sm:$0xff] %v1903_v51 }
 0x20a   :  { %2441 = shalt.err (!%p2438_p0)
}
 0x20b   :  { %s2442_s5 = scalar_lea.hbm %s2703_s4, 128 }
 0x20c   :  { %p2443_p1 = scmp.ne.s32.totalorder %s2703_s4, %s2442_s5  ;;  %p2446_p2 = scmp.lt.u32.totalorder %s2442_s5, %s2703_s4 }
 0x20e   :  { %p2448_p3 = pnand %p2446_p2, %p2443_p1 }
 0x210   :  { %2451 = shalt.err (!%p2448_p3)
}
 0x211   :  { %1914 = dma.vmem_to_hbm [thread:$0]  %s1912_s27, 128, %s2703_s4, [#allocation5]  }
 0x212   :  { %2456 = dma.done.wait [#allocation5], 128  }
 0x213   :  { %2457 = vsyncadd [#allocation5], 4294967168 }
 0x214   :  { %1918 = vsyncpa [#allocation4], 1 }
 0x215   :  { %1919 = vsyncpa [#allocation7], 1 }
 0x216   :  { %1920 = vsyncpa [#allocation5], 1 }

</bundles_post_ra>
